<compile_context>
chip_gen: v7x
topology: tpu7x:2x2x1
jax: 0.10.0
libtpu: 0.0.40
codegen_flags: <defaults>
</compile_context>

<pallas_src>
import numpy as np
import jax
import jax.numpy as jnp
from jax.experimental import pallas as pl
from jax.experimental.pallas import tpu as pltpu


def _round_up(n, m):
    return ((n + m - 1) // m) * m


def _round_down(n, m):
    return (n // m) * m


def _make_fm_kernel(F, D, reduce_sum):
    def kernel(x_ref, o_ref):
        # x_ref: (TB, F*D) flattened input block.
        # o_ref: (TB, 1) if reduce_sum else (TB, D).
        x = x_ref[...].astype(jnp.float32)
        tb = x.shape[0]
        s = jnp.zeros((tb, D), jnp.float32)
        sq = jnp.zeros((tb, D), jnp.float32)
        for f in range(F):  # static unroll over fields: lane slices of the block
            xf = x[:, f * D:(f + 1) * D]
            s = s + xf
            sq = sq + xf * xf
        ix = s * s - sq
        if reduce_sum:
            o_ref[...] = (0.5 * jnp.sum(ix, axis=1, keepdims=True)).astype(o_ref.dtype)
        else:
            o_ref[...] = (0.5 * ix).astype(o_ref.dtype)
    return kernel


def factorization_machine(x, reduce_sum=True, block_byte_budget=2 * 1024 * 1024):
    """Pallas equivalent of FactorizationMachine.forward.

    x: (B, F, D) float array (f32 or bf16).
    Returns (B, 1) if reduce_sum else (B, D), same dtype as x.
    """
    B, F, D = x.shape
    itemsize = jnp.dtype(x.dtype).itemsize

    # Sublane packing: 8 rows for 4-byte dtypes, 16 for 2-byte, 32 for 1-byte.
    mult = 8 * max(1, 4 // itemsize)
    row_bytes = F * D * itemsize
    tb_budget = max(mult, _round_down(block_byte_budget // max(row_bytes, 1), mult))
    TB = min(tb_budget, _round_up(B, mult))

    # Free row-major reshape: each grid step becomes one contiguous HBM read.
    x2 = x.reshape(B, F * D)

    grid = (pl.cdiv(B, TB),)  # ragged last block; OOB output rows masked on store
    in_spec = pl.BlockSpec((TB, F * D), lambda i: (i, 0))

    if reduce_sum:
        out_shape = jax.ShapeDtypeStruct((B, 1), x.dtype)
        out_spec = pl.BlockSpec((TB, 1), lambda i: (i, 0))
    else:
        out_shape = jax.ShapeDtypeStruct((B, D), x.dtype)
        out_spec = pl.BlockSpec((TB, D), lambda i: (i, 0))

    return pl.pallas_call(
        _make_fm_kernel(F, D, reduce_sum),
        out_shape=out_shape,
        grid_spec=pl.GridSpec(grid=grid, in_specs=[in_spec], out_specs=out_spec),
        compiler_params=pltpu.CompilerParams(
            dimension_semantics=("parallel",)),
    )(x2)


def _fm_reference(x, reduce_sum=True):
    x = x.astype(jnp.float32)
    square_of_sum = jnp.sum(x, axis=1) ** 2
    sum_of_square = jnp.sum(x * x, axis=1)
    ix = square_of_sum - sum_of_square
    if reduce_sum:
        ix = jnp.sum(ix, axis=1, keepdims=True)
    return 0.5 * ix


if __name__ == "__main__":
    key = jax.random.PRNGKey(0)

    # Case 1: aligned shapes, reduce_sum=True (module default).
    B, F, D = 8, 4, 128
    x = jax.random.normal(key, (B, F, D), dtype=jnp.float32)
    out = jax.block_until_ready(factorization_machine(x, reduce_sum=True))
    ref = _fm_reference(x, reduce_sum=True)
    np.testing.assert_allclose(np.asarray(out), np.asarray(ref),
                               rtol=1e-5, atol=1e-5)
    assert out.shape == (B, 1)
    assert out.dtype == jnp.float32

    # Case 2: unaligned batch / small embed_dim, reduce_sum=False (ragged block).
    B2, F2, D2 = 5, 3, 16
    x2 = jax.random.normal(jax.random.fold_in(key, 1), (B2, F2, D2),
                           dtype=jnp.float32)
    out2 = jax.block_until_ready(factorization_machine(x2, reduce_sum=False))
    ref2 = _fm_reference(x2, reduce_sum=False)
    np.testing.assert_allclose(np.asarray(out2), np.asarray(ref2),
                               rtol=1e-5, atol=1e-5)
    assert out2.shape == (B2, D2)

    # Case 3: bf16 input (half the HBM read bytes), f32 in-kernel accumulate.
    B3, F3, D3 = 37, 4, 32
    x3 = jax.random.normal(jax.random.fold_in(key, 2), (B3, F3, D3),
                           dtype=jnp.float32).astype(jnp.bfloat16)
    out3 = jax.block_until_ready(factorization_machine(x3, reduce_sum=True))
    ref3 = _fm_reference(x3, reduce_sum=True)
    np.testing.assert_allclose(np.asarray(out3, dtype=np.float32),
                               np.asarray(ref3),
                               rtol=2e-2, atol=1e-2)
    assert out3.shape == (B3, 1)
    assert out3.dtype == jnp.bfloat16

    print("KERNEL_OK")
</pallas_src>

<mosaic_0001>
module attributes {stable_mosaic.version = 11 : i64} {
  func.func @kernel(%arg0: i32, %arg1: memref<8x512xf32, #tpu.memory_space<vmem>>, %arg2: memref<8x1xf32, #tpu.memory_space<vmem>>) attributes {dimension_semantics = [#tpu.dimension_semantics<parallel>], iteration_bounds = array<i64: 1>, scalar_prefetch = 0 : i64, scratch_operands = 0 : i64, tpu.core_type = #tpu.core_type<tc>, window_params = [{transform_indices = @transform_0, window_bounds = array<i64: 8, 512>}, {transform_indices = @transform_1, window_bounds = array<i64: 8, 1>}]} {
    %c0 = arith.constant 0 : index
    %c0_0 = arith.constant 0 : index
    %0 = vector.load %arg1[%c0, %c0_0] : memref<8x512xf32, #tpu.memory_space<vmem>>, vector<8x512xf32>
    %cst = arith.constant 0.000000e+00 : f32
    %1 = vector.broadcast %cst : f32 to vector<8x128xf32>
    %cst_1 = arith.constant 0.000000e+00 : f32
    %2 = vector.broadcast %cst_1 : f32 to vector<8x128xf32>
    %3 = vector.extract_strided_slice %0 {offsets = [0, 0], sizes = [8, 128], strides = [1, 1]} : vector<8x512xf32> to vector<8x128xf32>
    %4 = arith.addf %1, %3 : vector<8x128xf32>
    %5 = arith.mulf %3, %3 : vector<8x128xf32>
    %6 = arith.addf %2, %5 : vector<8x128xf32>
    %7 = vector.extract_strided_slice %0 {offsets = [0, 128], sizes = [8, 128], strides = [1, 1]} : vector<8x512xf32> to vector<8x128xf32>
    %8 = arith.addf %4, %7 : vector<8x128xf32>
    %9 = arith.mulf %7, %7 : vector<8x128xf32>
    %10 = arith.addf %6, %9 : vector<8x128xf32>
    %11 = vector.extract_strided_slice %0 {offsets = [0, 256], sizes = [8, 128], strides = [1, 1]} : vector<8x512xf32> to vector<8x128xf32>
    %12 = arith.addf %8, %11 : vector<8x128xf32>
    %13 = arith.mulf %11, %11 : vector<8x128xf32>
    %14 = arith.addf %10, %13 : vector<8x128xf32>
    %15 = vector.extract_strided_slice %0 {offsets = [0, 384], sizes = [8, 128], strides = [1, 1]} : vector<8x512xf32> to vector<8x128xf32>
    %16 = arith.addf %12, %15 : vector<8x128xf32>
    %17 = arith.mulf %15, %15 : vector<8x128xf32>
    %18 = arith.addf %14, %17 : vector<8x128xf32>
    %19 = arith.mulf %16, %16 : vector<8x128xf32>
    %20 = arith.subf %19, %18 : vector<8x128xf32>
    %cst_2 = arith.constant dense<0.000000e+00> : vector<8xf32>
    %21 = vector.multi_reduction <add>, %20, %cst_2 [1] : vector<8x128xf32> to vector<8xf32>
    %22 = vector.shape_cast %21 : vector<8xf32> to vector<8x1xf32>
    %cst_3 = arith.constant 5.000000e-01 : f32
    %23 = vector.broadcast %cst_3 : f32 to vector<8x1xf32>
    %24 = arith.mulf %23, %22 : vector<8x1xf32>
    %c0_4 = arith.constant 0 : index
    %c0_5 = arith.constant 0 : index
    %25 = vector.load %arg2[%c0_4, %c0_5] : memref<8x1xf32, #tpu.memory_space<vmem>>, vector<8x1xf32>
    tpu.vector_store %arg2[%c0_4, %c0_5], %24 {strides = array<i32>} : memref<8x1xf32, #tpu.memory_space<vmem>>, vector<8x1xf32>,
    return
  }
  func.func @transform_0(%arg0: i32) -> (i32, i32) {
    %c0_i32 = arith.constant 0 : i32
    %c0_i32_0 = arith.constant 0 : i32
    return %arg0, %c0_i32 : i32, i32
  }
  func.func @transform_1(%arg0: i32) -> (i32, i32) {
    %c0_i32 = arith.constant 0 : i32
    %c0_i32_0 = arith.constant 0 : i32
    return %arg0, %c0_i32 : i32, i32
  }
}

</mosaic_0001>

<bundles_post_ra>
// kernel: tpu_custom_call.1
= control target key start
LH: loop header
LB: loop body
LE: loop exit
PB: predicated region body
PF: predicated region fallthrough
CT: control target
= control target key end

     0   :  { %6 = vsyncpa [#allocation3], 0  ;;  %s73_s6 = smov [#allocation2]   ;;  %s99_s0 = inlined_call_operand.hbm [shape: f32[8,512], index: 0, kind: input, shape index: {}]   ;;  %s100_s1 = inlined_call_operand.vmem [shape: f32[8,1], index: 1, kind: output, shape index: {}]  }
   0x1   :  { %s13_s7 = sshll.u32 %s73_s6, 4  ;;  %s49_s10 = scalar_lea.hbm %s99_s0, 512  ;;  %s14_s7 = int_to_ptr.vmem [resolvable:$true] %s13_s7 }
   0x2   :  { %p50_p0 = scmp.ne.s32.totalorder %s99_s0, %s49_s10  ;;  %p53_p1 = scmp.lt.u32.totalorder %s49_s10, %s99_s0 }
   0x4   :  { %p55_p2 = pnand %p53_p1, %p50_p0 }
   0x6   :  { %58 = shalt.err (!%p55_p2)
}
   0x7   :  { %s59_s15 = scalar_lea.vmem %s14_s7, 512  ;;  %p64_p4 = scmp.lt.s32.totalorder %s14_s7, %s14_s7 }
   0x8   :  { %p60_p3 = scmp.ne.s32.totalorder %s14_s7, %s59_s15  ;;  %p65_p5 = scmp.lt.s32.totalorder %s59_s15, %s59_s15 }
   0xa   :  { %p66_p6 = por %p65_p5, %p64_p4 }
   0xc   :  { %p67_p7 = pnand %p66_p6, %p60_p3 }
   0xe   :  { %70 = shalt.err (!%p67_p7)
}
   0xf   :  { %16 = dma.hbm_to_vmem [thread:$0]  %s99_s0, 512, %s14_s7, [#allocation3]  }
  0x10   :  { %71 = dma.done.wait [#allocation3], 512  }
  0x11   :  { %72 = vsyncadd [#allocation3], 4294966784  ;;  %v20_v0 = vld [vmem:[#allocation2] sm:$0xff]  ;;  %v21_v1 = vld [vmem:[#allocation2 + $0x8] sm:$0xff]  ;;  %vm41_vm0 = vcmask 7168  }
  0x12   :  { %v22_v2 = vld [vmem:[#allocation2 + $0x10] sm:$0xff]  ;;  %v23_v3 = vld [vmem:[#allocation2 + $0x18] sm:$0xff]  ;;  %v25_v4 = vmul.f32 %v20_v0, %v20_v0  ;;  %v27_v5 = vadd.f32 %v21_v1, %v20_v0  ;;  %v28_v6 = vmul.f32 %v21_v1, %v21_v1 }
  0x13   :  { %v31_v7 = vmul.f32 %v22_v2, %v22_v2  ;;  %v34_v10 = vmul.f32 %v23_v3, %v23_v3 }
  0x14   :  { %v29_v8 = vadd.f32 %v28_v6, %v25_v4  ;;  %v30_v9 = vadd.f32 %v27_v5, %v22_v2 }
  0x16   :  { %v32_v11 = vadd.f32 %v31_v7, %v29_v8  ;;  %v33_v12 = vadd.f32 %v30_v9, %v23_v3 }
  0x18   :  { %v35_v13 = vadd.f32 %v34_v10, %v32_v11  ;;  %v36_v14 = vmul.f32 %v33_v12, %v33_v12 }
  0x1a   :  { %v37_v15 = vsub.f32 %v36_v14, %v35_v13 }
  0x1c   :  { %38 = vadd.xlane.f32.xlu0 %v37_v15 }
  0xa9   :  { %v39_v16 = vpop.xlane.xlu0 %38 }
  0xaa   :  { %v40_v17 = vmul.f32 0.5, %v39_v16 }
  0xac   :  { %42 = vst.msk [vmem:[%s100_s1] sm:$0xff] %vm41_vm0, %v40_v17 }
  0xad   :  { %47 = vsyncpa [#allocation3], 1 }

</bundles_post_ra>
